<compile_context>
chip_gen: v6e
topology: v6e:2x2x1
jax: 0.10.0
libtpu: 0.0.40
codegen_flags: <defaults>
</compile_context>

<pallas_src>
import jax
import jax.numpy as jnp
from jax.experimental import pallas as pl
from jax.experimental.pallas import tpu as pltpu


def _round_up(x, m):
    return ((x + m - 1) // m) * m


# ---------------------------------------------------------------------------
# Kernel
# ---------------------------------------------------------------------------
def ffn_kernel(x_ref, w1_ref, b1_ref, w2_ref, b2_ref, o_ref, acc_ref):
    # grid = (row_tiles [parallel], ff_tiles [arbitrary / reduction])
    #
    # x_ref  : (tile_rows, d_model_p)  bf16 VMEM
    # w1_ref : (d_model_p, tile_ff)    bf16 VMEM
    # b1_ref : (1, tile_ff)            f32  VMEM
    # w2_ref : (tile_ff, d_model_p)    bf16 VMEM
    # b2_ref : (1, d_model_p)          f32  VMEM
    # o_ref  : (tile_rows, d_model_p)  out dtype, resident across the ff axis
    # acc_ref: (tile_rows, d_model_p)  f32 scratch accumulator
    j = pl.program_id(1)

    # First matmul on the MXU with f32 accumulation; bias + ReLU in f32.
    h = jnp.dot(x_ref[...], w1_ref[...], preferred_element_type=jnp.float32)
    h = jnp.maximum(h + b1_ref[...], 0.0)
    # TODO(synk): training-mode dropout mask would go here; identity in eval mode.

    # Second matmul: partial contribution of this d_ff slice (f32 accumulation).
    partial = jnp.dot(h.astype(w2_ref.dtype), w2_ref[...],
                      preferred_element_type=jnp.float32)

    # First ff step writes directly with b2 folded in (no zero-init pass).
    @pl.when(j == 0)
    def _():
        acc_ref[...] = partial + b2_ref[...]

    @pl.when(j > 0)
    def _():
        acc_ref[...] += partial

    @pl.when(j == pl.num_programs(1) - 1)
    def _():
        o_ref[...] = acc_ref[...].astype(o_ref.dtype)


# ---------------------------------------------------------------------------
# Per-chip planning
# ---------------------------------------------------------------------------
def _chip_defaults():
    """(tile_rows, tile_ff, vmem_limit_bytes, two_tensorcores) per TPU generation."""
    mib = 1024 * 1024
    kind = ""
    try:
        kind = jax.devices()[0].device_kind.lower()
    except Exception:
        pass
    vmem_phys = None
    try:
        vmem_phys = int(pltpu.get_tpu_info().vmem_capacity_bytes)
    except Exception:
        pass

    if "v7" in kind:
        # 64 MiB VMEM, 2 TensorCores; compute-bound above ~310 FLOP/byte.
        phys = vmem_phys or 64 * mib
        return 512, 256, max(32 * mib, min(52 * mib, phys - 8 * mib)), True
    if "v6" in kind:
        # 128 MiB VMEM; needs ~660 FLOP/byte vs weight streaming -> big row tiles.
        phys = vmem_phys or 128 * mib
        return 1024, 1024, max(32 * mib, min(100 * mib, phys - 16 * mib)), False
    if "v5" in kind:
        phys = vmem_phys or 128 * mib
        return 512, 512, max(32 * mib, min(100 * mib, phys - 16 * mib)), False
    # Unknown chip: conservative (assume small VMEM and 2 cores).
    phys = vmem_phys or 64 * mib
    return 512, 512, max(32 * mib, min(96 * mib, phys - 16 * mib)), True


def _plan_static(d_model_p, d_ff, compute_dtype, tile_rows=None, tile_ff=None):
    """Pick max row tile, ff tile and vmem_limit from chip + weight shapes only."""
    def_rows, def_ff, vmem_limit, two_cores = _chip_defaults()
    req_rows = def_rows if tile_rows is None else tile_rows
    req_ff = def_ff if tile_ff is None else tile_ff

    cbytes = jnp.dtype(compute_dtype).itemsize
    obytes = 4  # conservative (f32 output)

    t_rows = max(128, _round_up(req_rows, 128))
    t_ff = max(128, min(_round_up(req_ff, 128), _round_up(d_ff, 128)))

    def vmem_est(tr, tf):
        return (2 * tr * d_model_p * cbytes        # x tile (double-buffered)
                + 2 * d_model_p * tf * cbytes      # w1 slice
                + 2 * tf * d_model_p * cbytes      # w2 slice
                + 2 * (tf + d_model_p) * 4         # biases
                + 2 * tr * d_model_p * obytes      # out tile
                + tr * d_model_p * 4               # f32 accumulator scratch
                + 2 * tr * tf * 4)                 # f32 intermediate h + headroom

    budget = int(vmem_limit * 0.9)
    # Shrink tile_ff first (only changes DMA granularity), tile_rows last
    # (it sets arithmetic intensity vs the streamed weights).
    while vmem_est(t_rows, t_ff) > budget and t_ff > 256:
        t_ff = max(256, _round_up(t_ff // 2, 128))
    while vmem_est(t_rows, t_ff) > budget and t_rows > 128:
        t_rows = max(128, _round_up(t_rows // 2, 128))

    return t_rows, t_ff, vmem_limit, two_cores


def _choose_row_tile(rows, t_rows_max, two_cores):
    """Clamp the row tile to the problem; keep >=2 tiles on dual-TC chips."""
    row_align = 128 if rows >= 128 else 16  # bf16 sublane packing = 16
    t = max(row_align, min(_round_up(t_rows_max, row_align), _round_up(rows, row_align)))
    if two_cores:
        while _round_up(rows, t) // t < 2 and t >= 2 * row_align:
            t = max(row_align, _round_up(t // 2, row_align))
    return t


# ---------------------------------------------------------------------------
# pallas_call wrapper
# ---------------------------------------------------------------------------
def _ffn_pallas(x2d, w1, b1_2d, w2, b2_2d, *, tile_rows, tile_ff, vmem_limit,
                out_dtype):
    rows_p, d_model_p = x2d.shape
    d_ff_p = w1.shape[1]
    grid = (rows_p // tile_rows, d_ff_p // tile_ff)

    cbytes = jnp.dtype(x2d.dtype).itemsize
    obytes = jnp.dtype(out_dtype).itemsize
    n_row_tiles = grid[0]
    cost = pl.CostEstimate(
        flops=4 * rows_p * d_model_p * d_ff_p,
        transcendentals=0,
        bytes_accessed=(rows_p * d_model_p * (cbytes + obytes)            # x in + out
                        + n_row_tiles * 2 * d_model_p * d_ff_p * cbytes   # w1+w2 re-streamed per row tile
                        + (d_ff_p + d_model_p) * 4),                      # biases
    )

    return pl.pallas_call(
        ffn_kernel,
        out_shape=jax.ShapeDtypeStruct((rows_p, d_model_p), out_dtype),
        grid_spec=pltpu.PrefetchScalarGridSpec(
            num_scalar_prefetch=0,
            grid=grid,
            in_specs=[
                pl.BlockSpec((tile_rows, d_model_p), lambda i, j: (i, 0)),  # x tile
                pl.BlockSpec((d_model_p, tile_ff),   lambda i, j: (0, j)),  # w1 slice
                pl.BlockSpec((1, tile_ff),           lambda i, j: (0, j)),  # b1 slice
                pl.BlockSpec((tile_ff, d_model_p),   lambda i, j: (j, 0)),  # w2 slice
                pl.BlockSpec((1, d_model_p),         lambda i, j: (0, 0)),  # b2
            ],
            out_specs=pl.BlockSpec((tile_rows, d_model_p), lambda i, j: (i, 0)),
            scratch_shapes=[pltpu.VMEM((tile_rows, d_model_p), jnp.float32)],
        ),
        compiler_params=pltpu.CompilerParams(
            dimension_semantics=("parallel", "arbitrary"),
            vmem_limit_bytes=int(vmem_limit),
        ),
        cost_estimate=cost,
    )(x2d, w1, b1_2d, w2, b2_2d)


# ---------------------------------------------------------------------------
# Public API
# ---------------------------------------------------------------------------
def make_positionwise_feed_forward(w1, b1, w2, b2, *, tile_rows=None, tile_ff=None,
                                   compute_dtype=jnp.bfloat16):
    """Hoisted-weight entry point (recommended for hot loops).

    Pads (d_model -> 128 multiple, d_ff -> tile_ff multiple) and casts w1/w2 to
    bf16 ONCE, then returns a jitted function of x only. Weight layout:
        w1: [d_model, d_ff]  (nn.Linear weight pre-transposed), b1: [d_ff]
        w2: [d_ff, d_model],                                    b2: [d_model]
    """
    d_model, d_ff = w1.shape
    d_model_p = _round_up(d_model, 128)

    t_rows_max, t_ff, vmem_limit, two_cores = _plan_static(
        d_model_p, d_ff, compute_dtype, tile_rows=tile_rows, tile_ff=tile_ff)
    d_ff_p = _round_up(d_ff, t_ff)

    # One-time weight preprocessing (zero pads are exact no-ops through ReLU and
    # the second matmul).
    w1p = jnp.pad(w1, ((0, d_model_p - d_model), (0, d_ff_p - d_ff))).astype(compute_dtype)
    w2p = jnp.pad(w2, ((0, d_ff_p - d_ff), (0, d_model_p - d_model))).astype(compute_dtype)
    b1p = jnp.pad(b1.reshape(-1), ((0, d_ff_p - d_ff),)).reshape(1, d_ff_p).astype(jnp.float32)
    b2p = jnp.pad(b2.reshape(-1), ((0, d_model_p - d_model),)).reshape(1, d_model_p).astype(jnp.float32)

    @jax.jit
    def apply(x):
        batch, seq, dm = x.shape
        assert dm == d_model, "d_model mismatch"
        rows = batch * seq
        out_dtype = x.dtype

        t_rows = _choose_row_tile(rows, t_rows_max, two_cores)
        rows_p = _round_up(rows, t_rows)

        x2d = x.reshape(rows, d_model)
        if rows_p != rows or d_model_p != d_model:
            x2d = jnp.pad(x2d, ((0, rows_p - rows), (0, d_model_p - d_model)))
        x2d = x2d.astype(compute_dtype)

        out = _ffn_pallas(x2d, w1p, b1p, w2p, b2p,
                          tile_rows=t_rows, tile_ff=t_ff,
                          vmem_limit=vmem_limit, out_dtype=out_dtype)
        return out[:rows, :d_model].reshape(batch, seq, d_model)

    return apply


def positionwise_feed_forward(x, w1, b1, w2, b2, **kwargs):
    """One-shot convenience wrapper (re-prepares weights every call; prefer the
    factory `make_positionwise_feed_forward` in hot loops)."""
    return make_positionwise_feed_forward(w1, b1, w2, b2, **kwargs)(x)


def reference_ffn(x, w1, b1, w2, b2):
    h = jnp.maximum(jnp.einsum("bsd,df->bsf", x, w1) + b1, 0.0)
    return jnp.einsum("bsf,fd->bsd", h, w2) + b2


if __name__ == "__main__":
    batch, seq, d_model, d_ff = 2, 64, 128, 256

    key = jax.random.PRNGKey(0)
    kx, kw1, kb1, kw2, kb2 = jax.random.split(key, 5)

    x = jax.random.normal(kx, (batch, seq, d_model), dtype=jnp.float32)
    # Deterministic init mimicking nn.Linear's uniform(-1/sqrt(fan_in), 1/sqrt(fan_in)),
    # stored pre-transposed as [in, out].
    lim1 = 1.0 / (d_model ** 0.5)
    lim2 = 1.0 / (d_ff ** 0.5)
    w1 = jax.random.uniform(kw1, (d_model, d_ff), jnp.float32, -lim1, lim1)
    b1 = jax.random.uniform(kb1, (d_ff,),         jnp.float32, -lim1, lim1)
    w2 = jax.random.uniform(kw2, (d_ff, d_model), jnp.float32, -lim2, lim2)
    b2 = jax.random.uniform(kb2, (d_model,),      jnp.float32, -lim2, lim2)

    # Hoisted path: weights padded/cast once, kernel applied to x.
    ffn = make_positionwise_feed_forward(w1, b1, w2, b2)
    out = ffn(x)
    out = jax.block_until_ready(out)

    ref = reference_ffn(x, w1, b1, w2, b2)
    assert out.shape == (batch, seq, d_model)
    # bf16 operands + f32 accumulation: loosened tolerance vs the f32 reference.
    assert jnp.allclose(out, ref, atol=3e-2, rtol=3e-2), "mismatch vs reference"

    print("KERNEL_OK")
</pallas_src>

<mosaic_0001>
module attributes {stable_mosaic.version = 11 : i64} {
  func.func @ffn_kernel(%arg0: i32, %arg1: i32, %arg2: memref<128x128xbf16, #tpu.memory_space<vmem>>, %arg3: memref<128x256xbf16, #tpu.memory_space<vmem>>, %arg4: memref<1x256xf32, #tpu.memory_space<vmem>>, %arg5: memref<256x128xbf16, #tpu.memory_space<vmem>>, %arg6: memref<1x128xf32, #tpu.memory_space<vmem>>, %arg7: memref<128x128xf32, #tpu.memory_space<vmem>>, %arg8: memref<128x128xf32, #tpu.memory_space<vmem>>) attributes {dimension_semantics = [#tpu.dimension_semantics<parallel>, #tpu.dimension_semantics<arbitrary>], iteration_bounds = array<i64: 1, 1>, scalar_prefetch = 0 : i64, scratch_operands = 1 : i64, tpu.core_type = #tpu.core_type<tc>, window_params = [{transform_indices = @transform_0, window_bounds = array<i64: 128, 128>}, {transform_indices = @transform_1, window_bounds = array<i64: 128, 256>}, {transform_indices = @transform_2, window_bounds = array<i64: 1, 256>}, {transform_indices = @transform_3, window_bounds = array<i64: 256, 128>}, {pipeline_mode = #tpu.pipeline_mode<synchronous>, transform_indices = @transform_4, window_bounds = array<i64: 1, 128>}, {transform_indices = @transform_5, window_bounds = array<i64: 128, 128>}]} {
    %c0 = arith.constant 0 : index
    %c0_0 = arith.constant 0 : index
    %0 = vector.load %arg2[%c0, %c0_0] : memref<128x128xbf16, #tpu.memory_space<vmem>>, vector<128x128xbf16>
    %c0_1 = arith.constant 0 : index
    %c0_2 = arith.constant 0 : index
    %1 = vector.load %arg3[%c0_1, %c0_2] : memref<128x256xbf16, #tpu.memory_space<vmem>>, vector<128x256xbf16>
    %cst = arith.constant dense<0.000000e+00> : vector<128x256xf32>
    %2 = tpu.matmul %0, %1, %cst {dimension_numbers = #tpu.dot_dimension_numbers<[1], [0], [0], [1], [0, 0, 1, 1], [], []>} : vector<128x128xbf16>, vector<128x256xbf16>, vector<128x256xf32> -> vector<128x256xf32>
    %c0_3 = arith.constant 0 : index
    %c0_4 = arith.constant 0 : index
    %3 = vector.load %arg4[%c0_3, %c0_4] : memref<1x256xf32, #tpu.memory_space<vmem>>, vector<1x256xf32>
    %4 = vector.broadcast %3 : vector<1x256xf32> to vector<128x256xf32>
    %5 = arith.addf %2, %4 : vector<128x256xf32>
    %cst_5 = arith.constant 0.000000e+00 : f32
    %6 = vector.broadcast %cst_5 : f32 to vector<128x256xf32>
    %7 = arith.maximumf %5, %6 : vector<128x256xf32>
    %8 = arith.truncf %7 : vector<128x256xf32> to vector<128x256xbf16>
    %c0_6 = arith.constant 0 : index
    %c0_7 = arith.constant 0 : index
    %9 = vector.load %arg5[%c0_6, %c0_7] : memref<256x128xbf16, #tpu.memory_space<vmem>>, vector<256x128xbf16>
    %cst_8 = arith.constant dense<0.000000e+00> : vector<128x128xf32>
    %10 = tpu.matmul %8, %9, %cst_8 {dimension_numbers = #tpu.dot_dimension_numbers<[1], [0], [0], [1], [0, 0, 1, 1], [], []>} : vector<128x256xbf16>, vector<256x128xbf16>, vector<128x128xf32> -> vector<128x128xf32>
    %c0_i32 = arith.constant 0 : i32
    %11 = arith.cmpi eq, %arg1, %c0_i32 : i32
    %12 = arith.extui %11 : i1 to i32
    %c0_i32_9 = arith.constant 0 : i32
    %13 = arith.cmpi ne, %12, %c0_i32_9 : i32
    scf.if %13 {
      %c0_14 = arith.constant 0 : index
      %c0_15 = arith.constant 0 : index
      %20 = vector.load %arg6[%c0_14, %c0_15] : memref<1x128xf32, #tpu.memory_space<vmem>>, vector<1x128xf32>
      %21 = vector.broadcast %20 : vector<1x128xf32> to vector<128x128xf32>
      %22 = arith.addf %10, %21 : vector<128x128xf32>
      %c0_16 = arith.constant 0 : index
      %c0_17 = arith.constant 0 : index
      %23 = vector.load %arg8[%c0_16, %c0_17] : memref<128x128xf32, #tpu.memory_space<vmem>>, vector<128x128xf32>
      tpu.vector_store %arg8[%c0_16, %c0_17], %22 {strides = array<i32>} : memref<128x128xf32, #tpu.memory_space<vmem>>, vector<128x128xf32>,
    } else {
    }
    %c0_i32_10 = arith.constant 0 : i32
    %14 = arith.cmpi sgt, %arg1, %c0_i32_10 : i32
    %15 = arith.extui %14 : i1 to i32
    %c0_i32_11 = arith.constant 0 : i32
    %16 = arith.cmpi ne, %15, %c0_i32_11 : i32
    scf.if %16 {
      %c0_14 = arith.constant 0 : index
      %c0_15 = arith.constant 0 : index
      %20 = vector.load %arg8[%c0_14, %c0_15] : memref<128x128xf32, #tpu.memory_space<vmem>>, vector<128x128xf32>
      %21 = arith.addf %20, %10 : vector<128x128xf32>
      %c0_16 = arith.constant 0 : index
      %c0_17 = arith.constant 0 : index
      %22 = vector.load %arg8[%c0_16, %c0_17] : memref<128x128xf32, #tpu.memory_space<vmem>>, vector<128x128xf32>
      tpu.vector_store %arg8[%c0_16, %c0_17], %21 {strides = array<i32>} : memref<128x128xf32, #tpu.memory_space<vmem>>, vector<128x128xf32>,
    } else {
    }
    %c0_i32_12 = arith.constant 0 : i32
    %17 = arith.cmpi eq, %arg1, %c0_i32_12 : i32
    %18 = arith.extui %17 : i1 to i32
    %c0_i32_13 = arith.constant 0 : i32
    %19 = arith.cmpi ne, %18, %c0_i32_13 : i32
    scf.if %19 {
      %c0_14 = arith.constant 0 : index
      %c0_15 = arith.constant 0 : index
      %20 = vector.load %arg8[%c0_14, %c0_15] : memref<128x128xf32, #tpu.memory_space<vmem>>, vector<128x128xf32>
      %c0_16 = arith.constant 0 : index
      %c0_17 = arith.constant 0 : index
      %21 = vector.load %arg7[%c0_16, %c0_17] : memref<128x128xf32, #tpu.memory_space<vmem>>, vector<128x128xf32>
      tpu.vector_store %arg7[%c0_16, %c0_17], %20 {strides = array<i32>} : memref<128x128xf32, #tpu.memory_space<vmem>>, vector<128x128xf32>,
    } else {
    }
    return
  }
  func.func @transform_0(%arg0: i32, %arg1: i32) -> (i32, i32) {
    %c0_i32 = arith.constant 0 : i32
    %c0_i32_0 = arith.constant 0 : i32
    return %arg0, %c0_i32 : i32, i32
  }
  func.func @transform_1(%arg0: i32, %arg1: i32) -> (i32, i32) {
    %c0_i32 = arith.constant 0 : i32
    %c0_i32_0 = arith.constant 0 : i32
    return %c0_i32, %arg1 : i32, i32
  }
  func.func @transform_2(%arg0: i32, %arg1: i32) -> (i32, i32) {
    %c0_i32 = arith.constant 0 : i32
    %c0_i32_0 = arith.constant 0 : i32
    return %c0_i32, %arg1 : i32, i32
  }
  func.func @transform_3(%arg0: i32, %arg1: i32) -> (i32, i32) {
    %c0_i32 = arith.constant 0 : i32
    %c0_i32_0 = arith.constant 0 : i32
    return %arg1, %c0_i32 : i32, i32
  }
  func.func @transform_4(%arg0: i32, %arg1: i32) -> (i32, i32) {
    %c0_i32 = arith.constant 0 : i32
    %c0_i32_0 = arith.constant 0 : i32
    %c0_i32_1 = arith.constant 0 : i32
    return %c0_i32, %c0_i32_0 : i32, i32
  }
  func.func @transform_5(%arg0: i32, %arg1: i32) -> (i32, i32) {
    %c0_i32 = arith.constant 0 : i32
    %c0_i32_0 = arith.constant 0 : i32
    return %arg0, %c0_i32 : i32, i32
  }
}

</mosaic_0001>

<bundles_post_ra>
// kernel: apply.1
= control target key start
LH: loop header
LB: loop body
LE: loop exit
PB: predicated region body
PF: predicated region fallthrough
CT: control target
= control target key end

     0   :  { %10 = vsyncpa [#allocation4], 0  ;;  %s1130_s0 = inlined_call_operand.vmem [shape: bf16[128,128], index: 0, kind: input, shape index: {}]   ;;  %s1131_s1 = inlined_call_operand.hbm [shape: bf16[128,256], index: 1, kind: input, shape index: {}]   ;;  %s1132_s2 = inlined_call_operand.vmem [shape: f32[1,256], index: 2, kind: input, shape index: {}]   ;;  %s1133_s3 = inlined_call_operand.vmem [shape: bf16[256,128], index: 3, kind: input, shape index: {}]   ;;  %s1134_s4 = inlined_call_operand.vmem [shape: f32[1,128], index: 4, kind: input, shape index: {}]   ;;  %s1135_s5 = inlined_call_operand.hbm [shape: f32[128,128], index: 5, kind: output, shape index: {}]  }
   0x1   :  { %11 = vsyncpa [#allocation5], 0  ;;  %s943_s18 = smov [#allocation3]  }
   0x2   :  { %s19_s19 = sshll.u32 %s943_s18, 4  ;;  %s20_s19 = int_to_ptr.vmem [resolvable:$true] %s19_s19 }
   0x3   :  { %s907_s20 = scalar_lea.vmem %s20_s19, 2048  ;;  %p912_p1 = scmp.lt.s32.totalorder %s20_s19, %s20_s19 }
   0x4   :  { %p908_p0 = scmp.ne.s32.totalorder %s20_s19, %s907_s20  ;;  %p913_p2 = scmp.lt.s32.totalorder %s907_s20, %s907_s20 }
   0x6   :  { %p914_p3 = por %p913_p2, %p912_p1 }
   0x8   :  { %p915_p4 = pnand %p914_p3, %p908_p0 }
   0xa   :  { %918 = shalt.err (!%p915_p4)
}
   0xb   :  { %s944_s21 = smov 128   ;;  %s945_s22 = smov 8  }
   0xc   :  { %25 = dma.hbm_to_vmem [thread:$0]  %s1131_s1, 2048, %s20_s19, [#allocation4], %s944_s21, %s944_s21, %s945_s22  }
   0xd   :  { %939 = dma.done.wait [#allocation4], 2048  }
   0xe   :  { %940 = vsyncadd [#allocation4], 4294965248  ;;  %v946_v0 = vmov 0   ;;  %v851_v1 = vld [vmem:[#allocation3 + $0x74] ss:$8 sps:$4 sm:$0xff]   ;;  %v887_v19 = vld [vmem:[%s1133_s3 + $0x68] sm:$0xff]   ;;  %v70_v41 = vlaneseq }
   0xf   :  { %240 = vmatprep.mubr.bf16.mxu0 %v946_v0  ;;  %v853_v2 = vld [vmem:[#allocation3 + $0x70] ss:$8 sps:$4 sm:$0xff]   ;;  %208 = vmatprep.subr.bf16.mxu0 %v851_v1  ;;  %v854_v3 = vld [vmem:[#allocation3 + $0x64] ss:$8 sps:$4 sm:$0xff]   ;;  %v856_v4 = vld [vmem:[#allocation3 + $0x60] ss:$8 sps:$4 sm:$0xff]  }
  0x10   :  { %209 = vmatpush1.bf16.msra.mxu0 %v853_v2  ;;  %v857_v5 = vld [vmem:[#allocation3 + $0x54] ss:$8 sps:$4 sm:$0xff]   ;;  %v859_v6 = vld [vmem:[#allocation3 + $0x50] ss:$8 sps:$4 sm:$0xff]   ;;  %v860_v7 = vld [vmem:[#allocation3 + $0x44] ss:$8 sps:$4 sm:$0xff]  }
  0x11   :  { %210 = vmatprep.subr.bf16.mxu0 %v854_v3  ;;  %v862_v8 = vld [vmem:[#allocation3 + $0x40] ss:$8 sps:$4 sm:$0xff]   ;;  %v863_v9 = vld [vmem:[#allocation3 + $0x34] ss:$8 sps:$4 sm:$0xff]   ;;  %v865_v10 = vld [vmem:[#allocation3 + $0x30] ss:$8 sps:$4 sm:$0xff]  }
  0x12   :  { %v866_v11 = vld [vmem:[#allocation3 + $0x24] ss:$8 sps:$4 sm:$0xff]   ;;  %v868_v12 = vld [vmem:[#allocation3 + $0x20] ss:$8 sps:$4 sm:$0xff]   ;;  %v869_v13 = vld [vmem:[#allocation3 + $0x14] ss:$8 sps:$4 sm:$0xff]  }
  0x13   :  { %v883_v14 = vld [vmem:[%s1133_s3 + $0x78] sm:$0xff]   ;;  %v885_v17 = vld [vmem:[%s1133_s3 + $0x70] sm:$0xff]   ;;  %v872_v20 = vld [vmem:[#allocation3 + $0x4] ss:$8 sps:$4 sm:$0xff]   ;;  %v71_v42 = vshrl.u32 %v70_v41, 7 }
  0x14   :  { %211 = vmatpush1.bf16.msra.mxu0 %v856_v4  ;;  %v884_v15 = vld [vmem:[%s1133_s3 + $0x38] sm:$0xff]   ;;  %782 = vmatprep.subr.bf16.mxu1 %v883_v14  ;;  %v886_v18 = vld [vmem:[%s1133_s3 + $0x30] sm:$0xff]   ;;  %v874_v21 = vld [vmem:[#allocation3] ss:$8 sps:$4 sm:$0xff]  }
  0x15   :  { %212 = vmatprep.subr.bf16.mxu0 %v857_v5  ;;  %v871_v16 = vld [vmem:[#allocation3 + $0x10] ss:$8 sps:$4 sm:$0xff]   ;;  %783 = vmatpush3.bf16.msra.mxu1 %v884_v15  ;;  %v888_v22 = vld [vmem:[%s1133_s3 + $0x28] sm:$0xff]   ;;  %v889_v23 = vld [vmem:[%s1133_s3 + $0x60] sm:$0xff]   ;;  %v76_v43 = vsub.s32 1, %v71_v42  ;;  %v72_v44 = vsub.s32 0, %v71_v42 }
  0x16   :  { %784 = vmatprep.subr.bf16.mxu1 %v885_v17  ;;  %v875_v24 = vld [vmem:[%s1130_s0] sm:$0xff]   ;;  %v891_v26 = vld [vmem:[%s1133_s3 + $0x58] sm:$0xff]   ;;  %v876_v28 = vld [vmem:[%s1130_s0 + $0x8] sm:$0xff]  }
  0x17   :  { %v890_v25 = vld [vmem:[%s1133_s3 + $0x20] sm:$0xff]   ;;  %v892_v27 = vld [vmem:[%s1133_s3 + $0x18] sm:$0xff]   ;;  %v877_v29 = vld [vmem:[%s1130_s0 + $0x10] sm:$0xff]  }
  0x18   :  { %213 = vmatpush1.bf16.msra.mxu0 %v859_v6  ;;  %v878_v30 = vld [vmem:[%s1130_s0 + $0x18] sm:$0xff]   ;;  %v879_v31 = vld [vmem:[%s1130_s0 + $0x20] sm:$0xff]   ;;  %v880_v32 = vld [vmem:[%s1130_s0 + $0x28] sm:$0xff]  }
  0x19   :  { %214 = vmatprep.subr.bf16.mxu0 %v860_v7  ;;  %785 = vmatpush3.bf16.msra.mxu1 %v886_v18  ;;  %v881_v33 = vld [vmem:[%s1130_s0 + $0x30] sm:$0xff]   ;;  %v882_v34 = vld [vmem:[%s1130_s0 + $0x38] sm:$0xff]   ;;  %v895_v37 = vld [vmem:[%s1133_s3 + $0x48] sm:$0xff]  }
  0x1a   :  { %786 = vmatprep.subr.bf16.mxu1 %v887_v19  ;;  %v893_v35 = vld [vmem:[%s1133_s3 + $0x50] sm:$0xff]   ;;  %v896_v38 = vld [vmem:[%s1133_s3 + $0x8] sm:$0xff]   ;;  %v897_v39 = vld [vmem:[%s1133_s3 + $0x40] sm:$0xff]  }
  0x1b   :  { %v894_v36 = vld [vmem:[%s1133_s3 + $0x10] sm:$0xff]   ;;  %v898_v40 = vld [vmem:[%s1133_s3] sm:$0xff]  }
  0x1c   :  { %215 = vmatpush1.bf16.msra.mxu0 %v862_v8  ;;  %v68_v45 = vld [vmem:[%s1132_s2] sm:$0x3] }
  0x1d   :  { %216 = vmatprep.subr.bf16.mxu0 %v863_v9  ;;  %787 = vmatpush3.bf16.msra.mxu1 %v888_v22  ;;  %v1067_v47 = vrot.slane %v68_v45, %v76_v43  ;;  %v1069_v48 = vrot.slane %v68_v45, %v72_v44 }
  0x1e   :  { %788 = vmatprep.subr.bf16.mxu1 %v889_v23 }
  0x20   :  { %217 = vmatpush1.bf16.msra.mxu0 %v865_v10 }
  0x21   :  { %218 = vmatprep.subr.bf16.mxu0 %v866_v11  ;;  %789 = vmatpush3.bf16.msra.mxu1 %v890_v25 }
  0x22   :  { %790 = vmatprep.subr.bf16.mxu1 %v891_v26 }
  0x24   :  { %219 = vmatpush1.bf16.msra.mxu0 %v868_v12 }
  0x25   :  { %220 = vmatprep.subr.bf16.mxu0 %v869_v13  ;;  %791 = vmatpush3.bf16.msra.mxu1 %v892_v27 }
  0x26   :  { %792 = vmatprep.subr.bf16.mxu1 %v893_v35 }
  0x28   :  { %221 = vmatpush1.bf16.msra.mxu0 %v871_v16 }
  0x29   :  { %222 = vmatprep.subr.bf16.mxu0 %v872_v20  ;;  %793 = vmatpush3.bf16.msra.mxu1 %v894_v36 }
  0x2a   :  { %794 = vmatprep.subr.bf16.mxu1 %v895_v37 }
  0x2c   :  { %223 = vmatpush1.bf16.msra.mxu0 %v874_v21 }
  0x2d   :  { %795 = vmatpush3.bf16.msra.mxu1 %v896_v38 }
  0x2e   :  { %796 = vmatprep.subr.bf16.mxu1 %v897_v39 }
  0x2f   :  { %241 = vmatmul.mubr.bf16.vlgmr.msra.gmra.mxu0 %v875_v24 }
  0x30   :  { %250 = vmatprep.mubr.bf16.mxu0 %v946_v0 }
  0x31   :  { %797 = vmatpush3.bf16.msra.mxu1 %v898_v40 }
  0x37   :  { %251 = vmatmul.mubr.bf16.gmra.mxu0 %v876_v28 }
  0x38   :  { %260 = vmatprep.mubr.bf16.mxu0 %v946_v0 }
  0x3f   :  { %261 = vmatmul.mubr.bf16.gmra.mxu0 %v877_v29 }
  0x40   :  { %270 = vmatprep.mubr.bf16.mxu0 %v946_v0 }
  0x47   :  { %271 = vmatmul.mubr.bf16.gmra.mxu0 %v878_v30 }
  0x48   :  { %280 = vmatprep.mubr.bf16.mxu0 %v946_v0 }
  0x4f   :  { %281 = vmatmul.mubr.bf16.gmra.mxu0 %v879_v31 }
  0x50   :  { %290 = vmatprep.mubr.bf16.mxu0 %v946_v0 }
  0x57   :  { %291 = vmatmul.mubr.bf16.gmra.mxu0 %v880_v32 }
  0x58   :  { %300 = vmatprep.mubr.bf16.mxu0 %v946_v0 }
  0x5f   :  { %301 = vmatmul.mubr.bf16.gmra.mxu0 %v881_v33 }
  0x60   :  { %310 = vmatprep.mubr.bf16.mxu0 %v946_v0 }
  0x67   :  { %311 = vmatmul.mubr.bf16.gmra.mxu0 %v882_v34 }
  0xef   :  { %v242_v46 = vpop.f32.mrf.mxu0 }
  0xf0   :  { %v243_v53 = vadd.f32 %v242_v46, %v1069_v48 }
  0xf1   :  { %v244_v49 = vpop.f32.mrf.mxu0 }
  0xf2   :  { %v245_v51 = vadd.f32 %v244_v49, %v1067_v47  ;;  %v321_v60 = vmax.f32 %v243_v53, 0.0 }
  0xf3   :  { %v246_v50 = vpop.f32.mrf.mxu0 }
  0xf4   :  { %v247_v52 = vadd.f32 %v246_v50, %v1069_v48  ;;  %v322_v58 = vmax.f32 %v245_v51, 0.0 }
  0xf5   :  { %v248_v54 = vpop.f32.mrf.mxu0 }
  0xf6   :  { %v249_v55 = vadd.f32 %v248_v54, %v1067_v47  ;;  %v323_v56 = vmax.f32 %v247_v52, 0.0 }
  0xf7   :  { %v252_v57 = vpop.f32.mrf.mxu0 }
  0xf8   :  { %v324_v59 = vmax.f32 %v249_v55, 0.0  ;;  %v353_v63 = vpack.c.bf16 %v323_v56, %v321_v60  ;;  %v253_v3 = vadd.f32 %v252_v57, %v1069_v48 }
  0xf9   :  { %v254_v61 = vpop.f32.mrf.mxu0 }
  0xfa   :  { %v354_v62 = vpack.c.bf16 %v324_v59, %v322_v58  ;;  %v255_v1 = vadd.f32 %v254_v61, %v1067_v47  ;;  %v325_v10 = vmax.f32 %v253_v3, 0.0 }
  0xfb   :  { %v256_v0 = vpop.f32.mrf.mxu0 }
  0xfc   :  { %v257_v2 = vadd.f32 %v256_v0, %v1069_v48  ;;  %529 = vmatprep.mubr.bf16.mxu1 %v354_v62  ;;  %v326_v8 = vmax.f32 %v255_v1, 0.0 }
  0xfd   :  { %v258_v4 = vpop.f32.mrf.mxu0  ;;  %530 = vmatmul.mubr.bf16.vlgmr.msra.gmra.mxu1 %v353_v63 }
  0xfe   :  { %v259_v5 = vadd.f32 %v258_v4, %v1067_v47  ;;  %v327_v6 = vmax.f32 %v257_v2, 0.0 }
  0xff   :  { %v262_v7 = vpop.f32.mrf.mxu0 }
 0x100   :  { %v328_v9 = vmax.f32 %v259_v5, 0.0  ;;  %v355_v13 = vpack.c.bf16 %v327_v6, %v325_v10  ;;  %v263_v17 = vadd.f32 %v262_v7, %v1069_v48 }
 0x101   :  { %v264_v11 = vpop.f32.mrf.mxu0 }
 0x102   :  { %v356_v12 = vpack.c.bf16 %v328_v9, %v326_v8  ;;  %v265_v15 = vadd.f32 %v264_v11, %v1067_v47  ;;  %v329_v24 = vmax.f32 %v263_v17, 0.0 }
 0x103   :  { %v266_v14 = vpop.f32.mrf.mxu0 }
 0x104   :  { %v267_v16 = vadd.f32 %v266_v14, %v1069_v48  ;;  %537 = vmatprep.mubr.bf16.mxu1 %v356_v12  ;;  %v330_v22 = vmax.f32 %v265_v15, 0.0 }
 0x105   :  { %v268_v18 = vpop.f32.mrf.mxu0  ;;  %538 = vmatmul.mubr.bf16.gmra.mxu1 %v355_v13 }
 0x106   :  { %v269_v19 = vadd.f32 %v268_v18, %v1067_v47  ;;  %v331_v20 = vmax.f32 %v267_v16, 0.0 }
 0x107   :  { %v272_v21 = vpop.f32.mrf.mxu0 }
 0x108   :  { %v332_v23 = vmax.f32 %v269_v19, 0.0  ;;  %v357_v27 = vpack.c.bf16 %v331_v20, %v329_v24  ;;  %v273_v31 = vadd.f32 %v272_v21, %v1069_v48 }
 0x109   :  { %v274_v25 = vpop.f32.mrf.mxu0 }
 0x10a   :  { %v358_v26 = vpack.c.bf16 %v332_v23, %v330_v22  ;;  %v275_v29 = vadd.f32 %v274_v25, %v1067_v47  ;;  %v333_v38 = vmax.f32 %v273_v31, 0.0 }
 0x10b   :  { %v276_v28 = vpop.f32.mrf.mxu0 }
 0x10c   :  { %v277_v30 = vadd.f32 %v276_v28, %v1069_v48  ;;  %545 = vmatprep.mubr.bf16.mxu1 %v358_v26  ;;  %v334_v36 = vmax.f32 %v275_v29, 0.0 }
 0x10d   :  { %v278_v32 = vpop.f32.mrf.mxu0  ;;  %546 = vmatmul.mubr.bf16.gmra.mxu1 %v357_v27 }
 0x10e   :  { %v279_v33 = vadd.f32 %v278_v32, %v1067_v47  ;;  %v335_v34 = vmax.f32 %v277_v30, 0.0 }
 0x10f   :  { %v282_v35 = vpop.f32.mrf.mxu0 }
 0x110   :  { %v336_v37 = vmax.f32 %v279_v33, 0.0  ;;  %v359_v41 = vpack.c.bf16 %v335_v34, %v333_v38  ;;  %v283_v45 = vadd.f32 %v282_v35, %v1069_v48 }
 0x111   :  { %v284_v39 = vpop.f32.mrf.mxu0 }
 0x112   :  { %v360_v40 = vpack.c.bf16 %v336_v37, %v334_v36  ;;  %v285_v43 = vadd.f32 %v284_v39, %v1067_v47  ;;  %v337_v54 = vmax.f32 %v283_v45, 0.0  ;;  %v1106_v36 = vld [vmem:[%s1134_s4] ss:$0 sm:$0xff]  ;;  %s947_s4 = smov [#allocation6]  }
 0x113   :  { %v286_v42 = vpop.f32.mrf.mxu0  ;;  %s729_s25 = sshll.u32 %s947_s4, 4  ;;  %s730_s25 = int_to_ptr.vmem [resolvable:$true] %s729_s25 }
 0x114   :  { %v287_v44 = vadd.f32 %v286_v42, %v1069_v48  ;;  %553 = vmatprep.mubr.bf16.mxu1 %v360_v40  ;;  %v338_v52 = vmax.f32 %v285_v43, 0.0  ;;  %s919_s26 = scalar_lea.vmem %s730_s25, 2048  ;;  %p924_p6 = scmp.lt.s32.totalorder %s730_s25, %s730_s25 }
 0x115   :  { %v288_v46 = vpop.f32.mrf.mxu0  ;;  %554 = vmatmul.mubr.bf16.gmra.mxu1 %v359_v41  ;;  %p920_p5 = scmp.ne.s32.totalorder %s730_s25, %s919_s26  ;;  %p925_p7 = scmp.lt.s32.totalorder %s919_s26, %s919_s26 }
 0x116   :  { %v289_v49 = vadd.f32 %v288_v46, %v1067_v47  ;;  %v339_v50 = vmax.f32 %v287_v44, 0.0 }
 0x117   :  { %v292_v51 = vpop.f32.mrf.mxu0  ;;  %p926_p8 = por %p925_p7, %p924_p6 }
 0x118   :  { %v340_v53 = vmax.f32 %v289_v49, 0.0  ;;  %v361_v57 = vpack.c.bf16 %v339_v50, %v337_v54  ;;  %v293_v61 = vadd.f32 %v292_v51, %v1069_v48 }
 0x119   :  { %v294_v55 = vpop.f32.mrf.mxu0  ;;  %p927_p9 = pnand %p926_p8, %p920_p5 }
 0x11a   :  { %v362_v56 = vpack.c.bf16 %v340_v53, %v338_v52  ;;  %v295_v59 = vadd.f32 %v294_v55, %v1067_v47  ;;  %v341_v4 = vmax.f32 %v293_v61, 0.0 }
 0x11b   :  { %v296_v58 = vpop.f32.mrf.mxu0 }
 0x11c   :  { %v297_v60 = vadd.f32 %v296_v58, %v1069_v48  ;;  %561 = vmatprep.mubr.bf16.mxu1 %v362_v56  ;;  %v342_v2 = vmax.f32 %v295_v59, 0.0 }
 0x11d   :  { %v298_v62 = vpop.f32.mrf.mxu0  ;;  %562 = vmatmul.mubr.bf16.gmra.mxu1 %v361_v57 }
 0x11e   :  { %v299_v63 = vadd.f32 %v298_v62, %v1067_v47  ;;  %v343_v0 = vmax.f32 %v297_v60, 0.0 }
 0x11f   :  { %v302_v1 = vpop.f32.mrf.mxu0 }
 0x120   :  { %v344_v3 = vmax.f32 %v299_v63, 0.0  ;;  %v363_v7 = vpack.c.bf16 %v343_v0, %v341_v4  ;;  %v303_v11 = vadd.f32 %v302_v1, %v1069_v48 }
 0x121   :  { %v304_v5 = vpop.f32.mrf.mxu0 }
 0x122   :  { %v364_v6 = vpack.c.bf16 %v344_v3, %v342_v2  ;;  %v305_v9 = vadd.f32 %v304_v5, %v1067_v47  ;;  %v345_v18 = vmax.f32 %v303_v11, 0.0 }
 0x123   :  { %v306_v8 = vpop.f32.mrf.mxu0 }
 0x124   :  { %v307_v10 = vadd.f32 %v306_v8, %v1069_v48  ;;  %569 = vmatprep.mubr.bf16.mxu1 %v364_v6  ;;  %v346_v16 = vmax.f32 %v305_v9, 0.0 }
 0x125   :  { %v308_v12 = vpop.f32.mrf.mxu0  ;;  %570 = vmatmul.mubr.bf16.gmra.mxu1 %v363_v7 }
 0x126   :  { %v309_v13 = vadd.f32 %v308_v12, %v1067_v47  ;;  %v347_v14 = vmax.f32 %v307_v10, 0.0 }
 0x127   :  { %v312_v15 = vpop.f32.mrf.mxu0 }
 0x128   :  { %v348_v17 = vmax.f32 %v309_v13, 0.0  ;;  %v365_v21 = vpack.c.bf16 %v347_v14, %v345_v18  ;;  %v313_v25 = vadd.f32 %v312_v15, %v1069_v48 }
 0x129   :  { %v314_v19 = vpop.f32.mrf.mxu0 }
 0x12a   :  { %v366_v20 = vpack.c.bf16 %v348_v17, %v346_v16  ;;  %v315_v23 = vadd.f32 %v314_v19, %v1067_v47  ;;  %v349_v31 = vmax.f32 %v313_v25, 0.0 }
 0x12b   :  { %v316_v22 = vpop.f32.mrf.mxu0 }
 0x12c   :  { %v317_v24 = vadd.f32 %v316_v22, %v1069_v48  ;;  %577 = vmatprep.mubr.bf16.mxu1 %v366_v20  ;;  %v350_v29 = vmax.f32 %v315_v23, 0.0 }
 0x12d   :  { %v318_v26 = vpop.f32.mrf.mxu0  ;;  %578 = vmatmul.mubr.bf16.gmra.mxu1 %v365_v21 }
 0x12e   :  { %v319_v27 = vadd.f32 %v318_v26, %v1067_v47  ;;  %v351_v28 = vmax.f32 %v317_v24, 0.0 }
 0x130   :  { %v352_v30 = vmax.f32 %v319_v27, 0.0  ;;  %v367_v33 = vpack.c.bf16 %v351_v28, %v349_v31 }
 0x132   :  { %v368_v32 = vpack.c.bf16 %v352_v30, %v350_v29 }
 0x134   :  { %585 = vmatprep.mubr.bf16.mxu1 %v368_v32 }
 0x135   :  { %586 = vmatmul.mubr.bf16.gmra.mxu1 %v367_v33 }
 0x1bd   :  { %v798_v34 = vpop.f32.mrf.mxu1 }
 0x1bf   :  { %v799_v35 = vpop.f32.mrf.mxu1 }
 0x1c0   :  { %v800_v48 = vadd.f32 %v799_v35, %v798_v34 }
 0x1c1   :  { %v801_v37 = vpop.f32.mrf.mxu1 }
 0x1c2   :  { %v605_v38 = vadd.f32 %v800_v48, %v1106_v36 }
 0x1c3   :  { %v802_v47 = vpop.f32.mrf.mxu1 }
 0x1c4   :  { %708 = vst [vmem:[#allocation6] sm:$0xff] %v605_v38  ;;  %v803_v39 = vadd.f32 %v802_v47, %v801_v37 }
 0x1c5   :  { %v804_v40 = vpop.f32.mrf.mxu1 }
 0x1c6   :  { %v606_v41 = vadd.f32 %v803_v39, %v1106_v36 }
 0x1c7   :  { %v805_v42 = vpop.f32.mrf.mxu1 }
 0x1c8   :  { %709 = vst [vmem:[#allocation6 + $0x8] sm:$0xff] %v606_v41  ;;  %v806_v43 = vadd.f32 %v805_v42, %v804_v40 }
 0x1c9   :  { %v807_v44 = vpop.f32.mrf.mxu1 }
 0x1ca   :  { %v607_v45 = vadd.f32 %v806_v43, %v1106_v36 }
 0x1cb   :  { %v808_v46 = vpop.f32.mrf.mxu1 }
 0x1cc   :  { %710 = vst [vmem:[#allocation6 + $0x10] sm:$0xff] %v607_v45  ;;  %v809_v49 = vadd.f32 %v808_v46, %v807_v44 }
 0x1cd   :  { %v810_v50 = vpop.f32.mrf.mxu1 }
 0x1ce   :  { %v608_v51 = vadd.f32 %v809_v49, %v1106_v36 }
 0x1cf   :  { %v811_v52 = vpop.f32.mrf.mxu1 }
 0x1d0   :  { %711 = vst [vmem:[#allocation6 + $0x18] sm:$0xff] %v608_v51  ;;  %v812_v53 = vadd.f32 %v811_v52, %v810_v50 }
 0x1d1   :  { %v813_v54 = vpop.f32.mrf.mxu1 }
 0x1d2   :  { %v609_v55 = vadd.f32 %v812_v53, %v1106_v36 }
 0x1d3   :  { %v814_v56 = vpop.f32.mrf.mxu1 }
 0x1d4   :  { %712 = vst [vmem:[#allocation6 + $0x20] sm:$0xff] %v609_v55  ;;  %v815_v57 = vadd.f32 %v814_v56, %v813_v54 }
 0x1d5   :  { %v816_v58 = vpop.f32.mrf.mxu1 }
 0x1d6   :  { %v610_v59 = vadd.f32 %v815_v57, %v1106_v36 }
 0x1d7   :  { %v817_v60 = vpop.f32.mrf.mxu1 }
 0x1d8   :  { %713 = vst [vmem:[#allocation6 + $0x28] sm:$0xff] %v610_v59  ;;  %v818_v61 = vadd.f32 %v817_v60, %v816_v58 }
 0x1d9   :  { %v819_v62 = vpop.f32.mrf.mxu1 }
 0x1da   :  { %v611_v63 = vadd.f32 %v818_v61, %v1106_v36 }
 0x1db   :  { %v820_v0 = vpop.f32.mrf.mxu1 }
 0x1dc   :  { %714 = vst [vmem:[#allocation6 + $0x30] sm:$0xff] %v611_v63  ;;  %v821_v1 = vadd.f32 %v820_v0, %v819_v62 }
 0x1dd   :  { %v822_v2 = vpop.f32.mrf.mxu1 }
 0x1de   :  { %v612_v3 = vadd.f32 %v821_v1, %v1106_v36 }
 0x1df   :  { %v823_v4 = vpop.f32.mrf.mxu1 }
 0x1e0   :  { %715 = vst [vmem:[#allocation6 + $0x38] sm:$0xff] %v612_v3  ;;  %v824_v5 = vadd.f32 %v823_v4, %v822_v2 }
 0x1e1   :  { %v825_v6 = vpop.f32.mrf.mxu1 }
 0x1e2   :  { %v613_v7 = vadd.f32 %v824_v5, %v1106_v36 }
 0x1e3   :  { %v826_v8 = vpop.f32.mrf.mxu1 }
 0x1e4   :  { %716 = vst [vmem:[#allocation6 + $0x40] sm:$0xff] %v613_v7  ;;  %v827_v9 = vadd.f32 %v826_v8, %v825_v6 }
 0x1e5   :  { %v828_v10 = vpop.f32.mrf.mxu1 }
 0x1e6   :  { %v614_v11 = vadd.f32 %v827_v9, %v1106_v36 }
 0x1e7   :  { %v829_v12 = vpop.f32.mrf.mxu1 }
 0x1e8   :  { %717 = vst [vmem:[#allocation6 + $0x48] sm:$0xff] %v614_v11  ;;  %v830_v13 = vadd.f32 %v829_v12, %v828_v10 }
 0x1e9   :  { %v831_v14 = vpop.f32.mrf.mxu1 }
 0x1ea   :  { %v615_v15 = vadd.f32 %v830_v13, %v1106_v36 }
 0x1eb   :  { %v832_v16 = vpop.f32.mrf.mxu1 }
 0x1ec   :  { %718 = vst [vmem:[#allocation6 + $0x50] sm:$0xff] %v615_v15  ;;  %v833_v17 = vadd.f32 %v832_v16, %v831_v14 }
 0x1ed   :  { %v834_v18 = vpop.f32.mrf.mxu1 }
 0x1ee   :  { %v616_v19 = vadd.f32 %v833_v17, %v1106_v36 }
 0x1ef   :  { %v835_v20 = vpop.f32.mrf.mxu1 }
 0x1f0   :  { %719 = vst [vmem:[#allocation6 + $0x58] sm:$0xff] %v616_v19  ;;  %v836_v21 = vadd.f32 %v835_v20, %v834_v18 }
 0x1f1   :  { %v837_v22 = vpop.f32.mrf.mxu1 }
 0x1f2   :  { %v617_v23 = vadd.f32 %v836_v21, %v1106_v36 }
 0x1f3   :  { %v838_v24 = vpop.f32.mrf.mxu1 }
 0x1f4   :  { %720 = vst [vmem:[#allocation6 + $0x60] sm:$0xff] %v617_v23  ;;  %v839_v25 = vadd.f32 %v838_v24, %v837_v22 }
 0x1f5   :  { %v840_v26 = vpop.f32.mrf.mxu1 }
 0x1f6   :  { %v618_v27 = vadd.f32 %v839_v25, %v1106_v36 }
 0x1f7   :  { %v841_v28 = vpop.f32.mrf.mxu1 }
 0x1f8   :  { %721 = vst [vmem:[#allocation6 + $0x68] sm:$0xff] %v618_v27  ;;  %v842_v29 = vadd.f32 %v841_v28, %v840_v26 }
 0x1f9   :  { %v843_v30 = vpop.f32.mrf.mxu1 }
 0x1fa   :  { %v619_v31 = vadd.f32 %v842_v29, %v1106_v36 }
 0x1fb   :  { %v844_v32 = vpop.f32.mrf.mxu1 }
 0x1fc   :  { %722 = vst [vmem:[#allocation6 + $0x70] sm:$0xff] %v619_v31  ;;  %v845_v33 = vadd.f32 %v844_v32, %v843_v30 }
 0x1fe   :  { %v620_v34 = vadd.f32 %v845_v33, %v1106_v36 }
 0x200   :  { %723 = vst [vmem:[#allocation6 + $0x78] sm:$0xff] %v620_v34 }
 0x201   :  { %930 = shalt.err (!%p927_p9)
}
 0x202   :  { %735 = dma.vmem_to_hbm [thread:$0]  %s730_s25, 2048, %s1135_s5, [#allocation5], %s944_s21, %s944_s21, %s945_s22  }
 0x203   :  { %941 = dma.done.wait [#allocation5], 2048  }
 0x204   :  { %942 = vsyncadd [#allocation5], 4294965248 }
 0x205   :  { %739 = vsyncpa [#allocation4], 1 }
 0x206   :  { %740 = vsyncpa [#allocation5], 1 }

</bundles_post_ra>
